<compile_context>
chip_gen: v6e
topology: v6e:2x2x1
jax: 0.10.0
libtpu: 0.0.40
codegen_flags: <defaults>
</compile_context>

<pallas_src>
import math
import functools

import numpy as np
import jax
import jax.numpy as jnp
from jax.experimental import pallas as pl
from jax.experimental.pallas import tpu as pltpu

_LN_EPS = 1e-5                      # PyTorch nn.LayerNorm default
_INV_SQRT2 = 1.0 / math.sqrt(2.0)
_VMEM_TILE_BUDGET = 24 * 1024 * 1024   # per-call tile budget; fits v7x (64 MiB VMEM)
_VMEM_LIMIT_BYTES = 64 * 1024 * 1024   # raise scoped default (16/32 MiB on v5e/v6e)


def _round_up(a, b):
    return (a + b - 1) // b * b


def _ln_gelu(x, gamma, beta, inv_f):
    """LayerNorm (stats over real F features) + exact erf GELU, in f32."""
    # one-pass stats: padded feature lanes are zero so sums are unaffected;
    # divide by the *real* feature count (inv_f = 1/F).
    mean = jnp.sum(x, axis=-1, keepdims=True) * inv_f
    ex2 = jnp.sum(x * x, axis=-1, keepdims=True) * inv_f
    var = jnp.maximum(ex2 - mean * mean, 0.0)
    xhat = (x - mean) * jax.lax.rsqrt(var + _LN_EPS)
    y = xhat * gamma + beta            # padded lanes: gamma=beta=0 -> y=0
    # exact (erf) GELU, same as torch.nn.GELU() default
    return 0.5 * y * (1.0 + jax.lax.erf(y * _INV_SQRT2))


def _ln_gelu_kernel(gamma_ref, beta_ref, x_ref, o_ref, *, inv_f):
    """Eval-mode kernel: LayerNorm -> GELU (dropout is identity)."""
    x = x_ref[...].astype(jnp.float32)
    g = _ln_gelu(x, gamma_ref[...].astype(jnp.float32),
                 beta_ref[...].astype(jnp.float32), inv_f)
    o_ref[...] = g.astype(o_ref.dtype)


def _ln_gelu_dropout_kernel(gamma_ref, beta_ref, x_ref, bits_ref, o_ref, *,
                            inv_f, keep_thresh, inv_keep):
    """Training-mode kernel: LayerNorm -> GELU -> inverted dropout(p).

    Random bits are pre-generated uint32 (streamed in like x); keep iff
    bits < keep_thresh where keep_thresh = (1-p) * 2**32 (unsigned compare).
    """
    # TODO(synk): on real HW, pltpu.prng_seed/prng_random_bits inside the
    # kernel would halve training-path HBM traffic, but those primitives have
    # no interpret-mode lowering, so bits are generated host-side.
    x = x_ref[...].astype(jnp.float32)
    g = _ln_gelu(x, gamma_ref[...].astype(jnp.float32),
                 beta_ref[...].astype(jnp.float32), inv_f)
    keep = bits_ref[...] < keep_thresh           # uint32 threshold compare
    o_ref[...] = jnp.where(keep, g * inv_keep, 0.0).astype(o_ref.dtype)


def no_linearity_block(x, gamma, beta, *, p=0.1, training=False, rng_key=None):
    """Pallas implementation of NoLinearityBlock.forward.

    x: (B, S, F) float array. gamma/beta: (F,) LayerNorm affine params.
    """
    B, S, F = x.shape
    rows = B * S

    # ---- layout: lane-dense feature axis, VMEM-budgeted row tiles ----
    f_pad = _round_up(F, 128)
    n_streams = 3 if (training and p > 0.0) else 2   # x (+bits) + out
    bytes_per_row = f_pad * 4                        # f32 / uint32, conservative
    max_rows = max(16, _VMEM_TILE_BUDGET // (2 * n_streams * bytes_per_row))
    block_rows = min(1024, max_rows, _round_up(rows, 16))
    block_rows = max(16, (block_rows // 16) * 16)    # sublane-aligned (f32/bf16)
    rows_pad = _round_up(rows, block_rows)

    x2 = x.reshape(rows, F)
    if rows_pad != rows or f_pad != F:
        x2 = jnp.pad(x2, ((0, rows_pad - rows), (0, f_pad - F)))
    g1 = gamma
    b1 = beta
    if f_pad != F:
        g1 = jnp.pad(g1, (0, f_pad - F))
        b1 = jnp.pad(b1, (0, f_pad - F))
    gamma2 = g1.reshape(1, f_pad)
    beta2 = b1.reshape(1, f_pad)

    grid = (rows_pad // block_rows,)
    row_spec = pl.BlockSpec((block_rows, f_pad), lambda i: (i, 0))
    param_spec = pl.BlockSpec((1, f_pad), lambda i: (0, 0))
    out_shape = jax.ShapeDtypeStruct((rows_pad, f_pad), x.dtype)
    cparams = pltpu.CompilerParams(
        dimension_semantics=("parallel",),
        vmem_limit_bytes=_VMEM_LIMIT_BYTES)
    inv_f = 1.0 / float(F)

    if not training or p <= 0.0:
        out = pl.pallas_call(
            functools.partial(_ln_gelu_kernel, inv_f=inv_f),
            out_shape=out_shape,
            grid=grid,
            in_specs=[param_spec, param_spec, row_spec],
            out_specs=row_spec,
            compiler_params=cparams,
        )(gamma2, beta2, x2)
    else:
        if rng_key is None:
            rng_key = jax.random.PRNGKey(0)
        bits = jax.random.bits(rng_key, (rows_pad, f_pad), dtype=jnp.uint32)
        keep_thresh = np.uint32(min(int(round((1.0 - p) * 2.0**32)), 2**32 - 1))
        out = pl.pallas_call(
            functools.partial(_ln_gelu_dropout_kernel, inv_f=inv_f,
                              keep_thresh=keep_thresh,
                              inv_keep=1.0 / (1.0 - p)),
            out_shape=out_shape,
            grid=grid,
            in_specs=[param_spec, param_spec, row_spec, row_spec],
            out_specs=row_spec,
            compiler_params=cparams,
        )(gamma2, beta2, x2, bits)

    return out[:rows, :F].reshape(B, S, F)


if __name__ == "__main__":
    B, S, F = 2, 8, 32
    key = jax.random.PRNGKey(0)
    x = jax.random.normal(key, (B, S, F), dtype=jnp.float32)

    # deterministic parameter init (PyTorch LayerNorm default: weight=1, bias=0)
    gamma = jnp.ones((F,), dtype=jnp.float32)
    beta = jnp.zeros((F,), dtype=jnp.float32)

    # eval-mode forward (dropout = identity), checked against a pure-JAX ref
    out = no_linearity_block(x, gamma, beta, training=False)
    out = jax.block_until_ready(out)

    mean = jnp.mean(x, axis=-1, keepdims=True)
    var = jnp.mean(jnp.square(x - mean), axis=-1, keepdims=True)
    xhat = (x - mean) / jnp.sqrt(var + _LN_EPS)
    ref = jax.nn.gelu(xhat * gamma + beta, approximate=False)
    assert jnp.allclose(out, ref, atol=1e-5, rtol=1e-5), "eval-mode mismatch"

    # training-mode forward (dropout p=0.1 via uint32-threshold mask)
    out_train = no_linearity_block(x, gamma, beta, training=True,
                                   rng_key=jax.random.PRNGKey(123))
    out_train = jax.block_until_ready(out_train)
    kept = out_train != 0
    # kept elements must equal ref / (1-p); dropped elements are exactly zero
    assert jnp.allclose(jnp.where(kept, out_train, 0.0),
                        jnp.where(kept, ref / 0.9, 0.0),
                        atol=1e-5, rtol=1e-5), "train-mode mismatch"

    print("KERNEL_OK")
</pallas_src>

<mosaic_0001>
module attributes {stable_mosaic.version = 11 : i64} {
  func.func @_ln_gelu_kernel(%arg0: i32, %arg1: memref<1x128xf32, #tpu.memory_space<vmem>>, %arg2: memref<1x128xf32, #tpu.memory_space<vmem>>, %arg3: memref<16x128xf32, #tpu.memory_space<vmem>>, %arg4: memref<16x128xf32, #tpu.memory_space<vmem>>) attributes {dimension_semantics = [#tpu.dimension_semantics<parallel>], iteration_bounds = array<i64: 1>, scalar_prefetch = 0 : i64, scratch_operands = 0 : i64, tpu.core_type = #tpu.core_type<tc>, window_params = [{pipeline_mode = #tpu.pipeline_mode<synchronous>, transform_indices = @transform_0, window_bounds = array<i64: 1, 128>}, {pipeline_mode = #tpu.pipeline_mode<synchronous>, transform_indices = @transform_1, window_bounds = array<i64: 1, 128>}, {transform_indices = @transform_2, window_bounds = array<i64: 16, 128>}, {transform_indices = @transform_3, window_bounds = array<i64: 16, 128>}]} {
    %c0 = arith.constant 0 : index
    %c0_0 = arith.constant 0 : index
    %0 = vector.load %arg3[%c0, %c0_0] : memref<16x128xf32, #tpu.memory_space<vmem>>, vector<16x128xf32>
    %c0_1 = arith.constant 0 : index
    %c0_2 = arith.constant 0 : index
    %1 = vector.load %arg1[%c0_1, %c0_2] : memref<1x128xf32, #tpu.memory_space<vmem>>, vector<1x128xf32>
    %c0_3 = arith.constant 0 : index
    %c0_4 = arith.constant 0 : index
    %2 = vector.load %arg2[%c0_3, %c0_4] : memref<1x128xf32, #tpu.memory_space<vmem>>, vector<1x128xf32>
    %cst = arith.constant dense<0.000000e+00> : vector<16xf32>
    %3 = vector.multi_reduction <add>, %0, %cst [1] : vector<16x128xf32> to vector<16xf32>
    %4 = vector.shape_cast %3 : vector<16xf32> to vector<16x1xf32>
    %cst_5 = arith.constant 3.125000e-02 : f32
    %5 = vector.broadcast %cst_5 : f32 to vector<16x1xf32>
    %6 = arith.mulf %4, %5 : vector<16x1xf32>
    %7 = arith.mulf %0, %0 : vector<16x128xf32>
    %cst_6 = arith.constant dense<0.000000e+00> : vector<16xf32>
    %8 = vector.multi_reduction <add>, %7, %cst_6 [1] : vector<16x128xf32> to vector<16xf32>
    %9 = vector.shape_cast %8 : vector<16xf32> to vector<16x1xf32>
    %cst_7 = arith.constant 3.125000e-02 : f32
    %10 = vector.broadcast %cst_7 : f32 to vector<16x1xf32>
    %11 = arith.mulf %9, %10 : vector<16x1xf32>
    %12 = arith.mulf %6, %6 : vector<16x1xf32>
    %13 = arith.subf %11, %12 : vector<16x1xf32>
    %cst_8 = arith.constant 0.000000e+00 : f32
    %14 = vector.broadcast %cst_8 : f32 to vector<16x1xf32>
    %15 = arith.maximumf %13, %14 : vector<16x1xf32>
    %16 = vector.broadcast %6 : vector<16x1xf32> to vector<16x128xf32>
    %17 = arith.subf %0, %16 : vector<16x128xf32>
    %cst_9 = arith.constant 9.99999974E-6 : f32
    %18 = vector.broadcast %cst_9 : f32 to vector<16x1xf32>
    %19 = arith.addf %15, %18 : vector<16x1xf32>
    %20 = math.rsqrt %19 : vector<16x1xf32>
    %21 = vector.broadcast %20 : vector<16x1xf32> to vector<16x128xf32>
    %22 = arith.mulf %17, %21 : vector<16x128xf32>
    %23 = vector.broadcast %1 : vector<1x128xf32> to vector<16x128xf32>
    %24 = arith.mulf %22, %23 : vector<16x128xf32>
    %25 = vector.broadcast %2 : vector<1x128xf32> to vector<16x128xf32>
    %26 = arith.addf %24, %25 : vector<16x128xf32>
    %cst_10 = arith.constant 5.000000e-01 : f32
    %27 = vector.broadcast %cst_10 : f32 to vector<16x128xf32>
    %28 = arith.mulf %27, %26 : vector<16x128xf32>
    %cst_11 = arith.constant 0.707106769 : f32
    %29 = vector.broadcast %cst_11 : f32 to vector<16x128xf32>
    %30 = arith.mulf %26, %29 : vector<16x128xf32>
    %31 = math.erf %30 : vector<16x128xf32>
    %cst_12 = arith.constant 1.000000e+00 : f32
    %32 = vector.broadcast %cst_12 : f32 to vector<16x128xf32>
    %33 = arith.addf %32, %31 : vector<16x128xf32>
    %34 = arith.mulf %28, %33 : vector<16x128xf32>
    %c0_13 = arith.constant 0 : index
    %c0_14 = arith.constant 0 : index
    %35 = vector.load %arg4[%c0_13, %c0_14] : memref<16x128xf32, #tpu.memory_space<vmem>>, vector<16x128xf32>
    tpu.vector_store %arg4[%c0_13, %c0_14], %34 {strides = array<i32>} : memref<16x128xf32, #tpu.memory_space<vmem>>, vector<16x128xf32>,
    return
  }
  func.func @transform_0(%arg0: i32) -> (i32, i32) {
    %c0_i32 = arith.constant 0 : i32
    %c0_i32_0 = arith.constant 0 : i32
    %c0_i32_1 = arith.constant 0 : i32
    return %c0_i32, %c0_i32_0 : i32, i32
  }
  func.func @transform_1(%arg0: i32) -> (i32, i32) {
    %c0_i32 = arith.constant 0 : i32
    %c0_i32_0 = arith.constant 0 : i32
    %c0_i32_1 = arith.constant 0 : i32
    return %c0_i32, %c0_i32_0 : i32, i32
  }
  func.func @transform_2(%arg0: i32) -> (i32, i32) {
    %c0_i32 = arith.constant 0 : i32
    %c0_i32_0 = arith.constant 0 : i32
    return %arg0, %c0_i32 : i32, i32
  }
  func.func @transform_3(%arg0: i32) -> (i32, i32) {
    %c0_i32 = arith.constant 0 : i32
    %c0_i32_0 = arith.constant 0 : i32
    return %arg0, %c0_i32 : i32, i32
  }
}

</mosaic_0001>

<bundles_post_ra>
// kernel: tpu_custom_call.1
= control target key start
LH: loop header
LB: loop body
LE: loop exit
PB: predicated region body
PF: predicated region fallthrough
CT: control target
= control target key end

     0   :  { %8 = vsyncpa [#allocation3], 0  ;;  %s243_s0 = inlined_call_operand.hbm [shape: f32[1,128], index: 0, kind: input, shape index: {}]   ;;  %s244_s1 = inlined_call_operand.vmem [shape: f32[1,128], index: 1, kind: input, shape index: {}]   ;;  %s245_s2 = inlined_call_operand.hbm [shape: f32[16,128], index: 2, kind: input, shape index: {}]   ;;  %s246_s3 = inlined_call_operand.hbm [shape: f32[16,128], index: 3, kind: output, shape index: {}]  }
   0x1   :  { %9 = vsyncpa [#allocation6], 0 }
   0x2   :  { %10 = vsyncpa [#allocation4], 0  ;;  %s200_s12 = smov [#allocation2]   ;;  %s201_s14 = smov [#allocation5]  }
   0x3   :  { %s17_s13 = sshll.u32 %s200_s12, 4  ;;  %s28_s15 = sshll.u32 %s201_s14, 4  ;;  %s18_s13 = int_to_ptr.vmem [resolvable:$true] %s17_s13  ;;  %s29_s15 = int_to_ptr.vmem [resolvable:$true] %s28_s15 }
   0x4   :  { %s142_s16 = scalar_lea.vmem %s18_s13, 16  ;;  %s146_s17 = scalar_lea.vmem %s18_s13, 32 }
   0x5   :  { %p143_p0 = scmp.ne.s32.totalorder %s18_s13, %s142_s16  ;;  %p147_p1 = scmp.lt.s32.totalorder %s18_s13, %s18_s13 }
   0x6   :  { %p148_p2 = scmp.lt.s32.totalorder %s146_s17, %s142_s16 }
   0x8   :  { %p149_p3 = por %p148_p2, %p147_p1 }
   0xa   :  { %p150_p4 = pnand %p149_p3, %p143_p0 }
   0xc   :  { %153 = shalt.err (!%p150_p4)
}
   0xd   :  { %20 = dma.hbm_to_vmem [thread:$0]  %s243_s0, 16, %s18_s13, [#allocation3]  }
   0xe   :  { %s162_s20 = scalar_lea.vmem %s29_s15, 256  ;;  %p167_p6 = scmp.lt.s32.totalorder %s29_s15, %s29_s15 }
   0xf   :  { %p163_p5 = scmp.ne.s32.totalorder %s29_s15, %s162_s20  ;;  %p168_p7 = scmp.lt.s32.totalorder %s162_s20, %s162_s20 }
  0x11   :  { %p169_p8 = por %p168_p7, %p167_p6 }
  0x13   :  { %p170_p9 = pnand %p169_p8, %p163_p5 }
  0x15   :  { %173 = shalt.err (!%p170_p9)
}
  0x16   :  { %s202_s21 = smov 128   ;;  %s203_s22 = smov 8  }
  0x17   :  { %34 = dma.hbm_to_vmem [thread:$0]  %s245_s2, 256, %s29_s15, [#allocation6], %s202_s21, %s202_s21, %s203_s22  }
  0x18   :  { %194 = dma.done.wait [#allocation3], 16  }
  0x19   :  { %195 = vsyncadd [#allocation3], 4294967280 }
  0x1a   :  { %196 = dma.done.wait [#allocation6], 256  }
  0x1b   :  { %197 = vsyncadd [#allocation6], 4294967040  ;;  %v41_v0 = vld [vmem:[#allocation5] sm:$0xff]  ;;  %v42_v1 = vld [vmem:[#allocation5 + $0x8] sm:$0xff]  ;;  %s204_s25 = smov [#allocation7]  }
  0x1c   :  { %45 = vadd.xlane.f32.xlu0 %v41_v0  ;;  %v51_v2 = vmul.f32 %v41_v0, %v41_v0  ;;  %v52_v3 = vmul.f32 %v42_v1, %v42_v1  ;;  %v119_v22 = vld [vmem:[#allocation2] ss:$0 sm:$0xff]  ;;  %s106_s26 = sshll.u32 %s204_s25, 4  ;;  %s107_s26 = int_to_ptr.vmem [resolvable:$true] %s106_s26 }
  0x1d   :  { %v120_v24 = vld [vmem:[%s244_s1] ss:$0 sm:$0xff]  ;;  %s174_s1 = scalar_lea.vmem %s107_s26, 256  ;;  %p179_p11 = scmp.lt.s32.totalorder %s107_s26, %s107_s26 }
  0x1e   :  { %53 = vadd.xlane.f32.xlu1 %v51_v2  ;;  %p175_p10 = scmp.ne.s32.totalorder %s107_s26, %s174_s1  ;;  %p180_p12 = scmp.lt.s32.totalorder %s174_s1, %s174_s1 }
  0x20   :  { %47 = vadd.xlane.f32.xlu0 %v42_v1  ;;  %p181_p13 = por %p180_p12, %p179_p11 }
  0x22   :  { %55 = vadd.xlane.f32.xlu1 %v52_v3  ;;  %p182_p0 = pnand %p181_p13, %p175_p10 }
  0xa5   :  { %v46_v4 = vpop.xlane.xlu0 %45 }
  0xa6   :  { %v49_v5 = vmul.f32 0.03125, %v46_v4 }
  0xa7   :  { %v54_v6 = vpop.xlane.xlu1 %53 }
  0xa8   :  { %v59_v7 = vmul.f32 %v49_v5, %v49_v5  ;;  %v57_v8 = vmul.f32 0.03125, %v54_v6  ;;  %v65_v20 = vsub.f32 %v41_v0, %v49_v5 }
  0xa9   :  { %v48_v9 = vpop.xlane.xlu0 %47 }
  0xaa   :  { %v61_v10 = vsub.f32 %v57_v8, %v59_v7  ;;  %v50_v11 = vmul.f32 0.03125, %v48_v9 }
  0xab   :  { %v56_v12 = vpop.xlane.xlu1 %55 }
  0xac   :  { %v63_v13 = vmax.f32 %v61_v10, 0.0  ;;  %v60_v14 = vmul.f32 %v50_v11, %v50_v11  ;;  %v58_v15 = vmul.f32 0.03125, %v56_v12  ;;  %v66_v25 = vsub.f32 %v42_v1, %v50_v11 }
  0xae   :  { %v67_v16 = vadd.f32 1e-05, %v63_v13  ;;  %v62_v17 = vsub.f32 %v58_v15, %v60_v14 }
  0xb0   :  { %126 = vrsqrt.f32 %v67_v16  ;;  %v64_v18 = vmax.f32 %v62_v17, 0.0 }
  0xb2   :  { %v68_v19 = vadd.f32 1e-05, %v64_v18 }
  0xb4   :  { %128 = vrsqrt.f32 %v68_v19 }
  0xbd   :  { %v127_v21 = vpop.eup %126 }
  0xbe   :  { %v71_v23 = vmul.f32 %v127_v21, %v65_v20 }
  0xc0   :  { %v79_v26 = vmul.f32 %v119_v22, %v71_v23 }
  0xc1   :  { %v129_v27 = vpop.eup %128 }
  0xc2   :  { %v72_v28 = vmul.f32 %v129_v27, %v66_v25  ;;  %v87_v29 = vadd.f32 %v120_v24, %v79_v26 }
  0xc4   :  { %v80_v30 = vmul.f32 %v119_v22, %v72_v28  ;;  %v91_v31 = vmul.f32 0.70710677, %v87_v29  ;;  %v89_v35 = vmul.f32 0.5, %v87_v29 }
  0xc6   :  { %v88_v32 = vadd.f32 %v120_v24, %v80_v30  ;;  %130 = verf.f32 %v91_v31 }
  0xc8   :  { %v92_v33 = vmul.f32 0.70710677, %v88_v32  ;;  %v90_v39 = vmul.f32 0.5, %v88_v32 }
  0xca   :  { %132 = verf.f32 %v92_v33 }
  0xd3   :  { %v131_v34 = vpop.eup %130 }
  0xd4   :  { %v95_v36 = vadd.f32 1.0, %v131_v34 }
  0xd6   :  { %v97_v37 = vmul.f32 %v95_v36, %v89_v35 }
  0xd7   :  { %v133_v38 = vpop.eup %132 }
  0xd8   :  { %v96_v40 = vadd.f32 1.0, %v133_v38  ;;  %99 = vst [vmem:[#allocation7] sm:$0xff] %v97_v37 }
  0xda   :  { %v98_v41 = vmul.f32 %v96_v40, %v90_v39 }
  0xdc   :  { %100 = vst [vmem:[#allocation7 + $0x8] sm:$0xff] %v98_v41 }
  0xdd   :  { %185 = shalt.err (!%p182_p0)
}
  0xde   :  { %112 = dma.vmem_to_hbm [thread:$0]  %s107_s26, 256, %s246_s3, [#allocation4], %s202_s21, %s202_s21, %s203_s22  }
  0xdf   :  { %198 = dma.done.wait [#allocation4], 256  }
  0xe0   :  { %199 = vsyncadd [#allocation4], 4294967040 }
  0xe1   :  { %116 = vsyncpa [#allocation3], 1 }
  0xe2   :  { %117 = vsyncpa [#allocation6], 1 }
  0xe3   :  { %118 = vsyncpa [#allocation4], 1 }

</bundles_post_ra>
